<compile_context>
chip_gen: v7x
topology: tpu7x:2x2x1
jax: 0.10.0
libtpu: 0.0.40
codegen_flags: <defaults>
</compile_context>

<pallas_src>
import jax
import jax.numpy as jnp
from jax.experimental import pallas as pl
from jax.experimental.pallas import tpu as pltpu


def _round_up(x: int, m: int) -> int:
    return ((x + m - 1) // m) * m


def _event_encoder_kernel(x_ref, emb_ref, o_ref):
    # x_ref:   (TB, Vp) float32   -- multi-hot / count label rows (zero-padded cols)
    # emb_ref: (Vp, Ep) bfloat16  -- label embedding table (zero-padded rows/cols)
    # o_ref:   (TB, Ep) float32
    x = x_ref[...]

    # Row sums in f32 (padded columns are zero, so they don't change the sum).
    row_sum = jnp.sum(x, axis=1, keepdims=True)                     # (TB, 1)
    # Tiny guard so padded / all-zero rows don't produce inf * 0 = NaN.
    inv = pl.reciprocal(jnp.maximum(row_sum, 1e-30), approx=True)   # EUP vrcp

    # MXU matmul in bf16 with f32 accumulation; normalize afterwards (linearity).
    acc = jnp.dot(
        x.astype(jnp.bfloat16),
        emb_ref[...],
        preferred_element_type=jnp.float32,
    )                                                               # (TB, Ep) f32

    o_ref[...] = acc * inv


def event_encoder(word_idxs: jax.Array, label_embedding: jax.Array,
                  *, block_b: int = 256) -> jax.Array:
    """Pallas implementation of EventEncoder.forward.

    word_idxs:       (B, V) float
    label_embedding: (V, E) float
    returns:         (B, E) float32
    """
    B, V = word_idxs.shape
    V2, E = label_embedding.shape
    assert V == V2

    # Lane-dense padding: V and E up to multiples of 128.
    Vp = _round_up(V, 128)
    Ep = _round_up(E, 128)

    # Batch tiling: single full-array block when B is small, otherwise 256-row
    # tiles (multiple of 8 sublanes; fills the 2x256^2 MXU on v6e/v7x).
    if B <= block_b:
        TB = B
        Bp = B
    else:
        TB = block_b
        Bp = _round_up(B, TB)

    x = word_idxs.astype(jnp.float32)
    if (Bp, Vp) != (B, V):
        x = jnp.pad(x, ((0, Bp - B), (0, Vp - V)))

    emb = label_embedding.astype(jnp.bfloat16)
    if (Vp, Ep) != (V, E):
        emb = jnp.pad(emb, ((0, Vp - V), (0, Ep - E)))

    grid = (Bp // TB,)

    out = pl.pallas_call(
        _event_encoder_kernel,
        out_shape=jax.ShapeDtypeStruct((Bp, Ep), jnp.float32),
        grid=grid,
        in_specs=[
            pl.BlockSpec((TB, Vp), lambda i: (i, 0)),   # x: tiled over batch
            pl.BlockSpec((Vp, Ep), lambda i: (0, 0)),   # embedding: resident in VMEM
        ],
        out_specs=pl.BlockSpec((TB, Ep), lambda i: (i, 0)),
        compiler_params=pltpu.CompilerParams(
            dimension_semantics=("parallel",),          # shard batch steps across TCs (v7x)
        ),
    )(x, emb)

    # Strip padding back to the logical shape.
    return out[:B, :E]


if __name__ == "__main__":
    # Deterministic init (mirrors nn.Parameter(torch.randn(vocab, emb))).
    key = jax.random.PRNGKey(0)
    k_emb, k_x = jax.random.split(key)

    vocab_size = 527   # default from the module
    emb_dim = 32
    batch = 2

    label_embedding = jax.random.normal(k_emb, (vocab_size, emb_dim), dtype=jnp.float32)

    # Multi-hot style label indicator vector (non-negative, non-zero rows).
    word_idxs = (jax.random.uniform(k_x, (batch, vocab_size), dtype=jnp.float32) > 0.9)
    word_idxs = word_idxs.astype(jnp.float32) + 1e-3  # avoid all-zero rows

    out = event_encoder(word_idxs, label_embedding)
    out = jax.block_until_ready(out)

    # Reference in plain JAX (same semantics as the PyTorch forward), f32.
    ref = (word_idxs / jnp.sum(word_idxs, axis=1, keepdims=True)) @ label_embedding

    assert out.shape == (batch, emb_dim)
    # Tolerance loosened to account for bf16 MXU inputs + approx reciprocal
    # (f32 accumulation keeps the error ~1e-3 absolute at these magnitudes).
    assert jnp.allclose(out, ref, atol=1e-2, rtol=1e-2), float(jnp.max(jnp.abs(out - ref)))

    print("KERNEL_OK")
</pallas_src>

<mosaic_0001>
module attributes {stable_mosaic.version = 11 : i64} {
  func.func @_event_encoder_kernel(%arg0: i32, %arg1: memref<2x640xf32, #tpu.memory_space<vmem>>, %arg2: memref<640x128xbf16, #tpu.memory_space<vmem>>, %arg3: memref<2x128xf32, #tpu.memory_space<vmem>>) attributes {dimension_semantics = [#tpu.dimension_semantics<parallel>], iteration_bounds = array<i64: 1>, scalar_prefetch = 0 : i64, scratch_operands = 0 : i64, tpu.core_type = #tpu.core_type<tc>, window_params = [{transform_indices = @transform_0, window_bounds = array<i64: 2, 640>}, {pipeline_mode = #tpu.pipeline_mode<synchronous>, transform_indices = @transform_1, window_bounds = array<i64: 640, 128>}, {transform_indices = @transform_2, window_bounds = array<i64: 2, 128>}]} {
    %c0 = arith.constant 0 : index
    %c0_0 = arith.constant 0 : index
    %0 = vector.load %arg1[%c0, %c0_0] : memref<2x640xf32, #tpu.memory_space<vmem>>, vector<2x640xf32>
    %cst = arith.constant dense<0.000000e+00> : vector<2xf32>
    %1 = vector.multi_reduction <add>, %0, %cst [1] : vector<2x640xf32> to vector<2xf32>
    %2 = vector.shape_cast %1 : vector<2xf32> to vector<2x1xf32>
    %cst_1 = arith.constant 1.000000e-30 : f32
    %3 = vector.broadcast %cst_1 : f32 to vector<2x1xf32>
    %4 = arith.maximumf %2, %3 : vector<2x1xf32>
    %5 = tpu.reciprocal %4 {approx = true} : vector<2x1xf32> -> vector<2x1xf32>
    %6 = arith.truncf %0 : vector<2x640xf32> to vector<2x640xbf16>
    %c0_2 = arith.constant 0 : index
    %c0_3 = arith.constant 0 : index
    %7 = vector.load %arg2[%c0_2, %c0_3] : memref<640x128xbf16, #tpu.memory_space<vmem>>, vector<640x128xbf16>
    %cst_4 = arith.constant dense<0.000000e+00> : vector<2x128xf32>
    %8 = tpu.matmul %6, %7, %cst_4 {dimension_numbers = #tpu.dot_dimension_numbers<[1], [0], [0], [1], [0, 0, 1, 1], [], []>} : vector<2x640xbf16>, vector<640x128xbf16>, vector<2x128xf32> -> vector<2x128xf32>
    %9 = vector.broadcast %5 : vector<2x1xf32> to vector<2x128xf32>
    %10 = arith.mulf %8, %9 : vector<2x128xf32>
    %c0_5 = arith.constant 0 : index
    %c0_6 = arith.constant 0 : index
    %11 = vector.load %arg3[%c0_5, %c0_6] : memref<2x128xf32, #tpu.memory_space<vmem>>, vector<2x128xf32>
    tpu.vector_store %arg3[%c0_5, %c0_6], %10 {strides = array<i32>} : memref<2x128xf32, #tpu.memory_space<vmem>>, vector<2x128xf32>,
    return
  }
  func.func @transform_0(%arg0: i32) -> (i32, i32) {
    %c0_i32 = arith.constant 0 : i32
    %c0_i32_0 = arith.constant 0 : i32
    return %arg0, %c0_i32 : i32, i32
  }
  func.func @transform_1(%arg0: i32) -> (i32, i32) {
    %c0_i32 = arith.constant 0 : i32
    %c0_i32_0 = arith.constant 0 : i32
    %c0_i32_1 = arith.constant 0 : i32
    return %c0_i32, %c0_i32_0 : i32, i32
  }
  func.func @transform_2(%arg0: i32) -> (i32, i32) {
    %c0_i32 = arith.constant 0 : i32
    %c0_i32_0 = arith.constant 0 : i32
    return %arg0, %c0_i32 : i32, i32
  }
}

</mosaic_0001>

<bundles_post_ra>
// kernel: tpu_custom_call.1
= control target key start
LH: loop header
LB: loop body
LE: loop exit
PB: predicated region body
PF: predicated region fallthrough
CT: control target
= control target key end

     0   :  { %7 = vsyncpa [#allocation3], 0  ;;  %s857_s0 = inlined_call_operand.hbm [shape: f32[2,640], index: 0, kind: input, shape index: {}]   ;;  %s858_s1 = inlined_call_operand.hbm [shape: bf16[640,128], index: 1, kind: input, shape index: {}]   ;;  %s859_s2 = inlined_call_operand.hbm [shape: f32[2,128], index: 2, kind: output, shape index: {}]  }
   0x1   :  { %8 = vsyncpa [#allocation6], 0 }
   0x2   :  { %9 = vsyncpa [#allocation4], 0  ;;  %s786_s9 = smov [#allocation2]   ;;  %s787_s11 = smov [#allocation5]  }
   0x3   :  { %s16_s10 = sshll.u32 %s786_s9, 4  ;;  %s25_s12 = sshll.u32 %s787_s11, 4  ;;  %s17_s10 = int_to_ptr.vmem [resolvable:$true] %s16_s10  ;;  %s809_s12 = int_to_ptr.vmem [resolvable:$true] %s25_s12 }
   0x4   :  { %s714_s15 = scalar_lea.hbm %s857_s0, 160 }
   0x5   :  { %p715_p0 = scmp.ne.s32.totalorder %s857_s0, %s714_s15  ;;  %p718_p1 = scmp.lt.u32.totalorder %s714_s15, %s857_s0 }
   0x7   :  { %p720_p2 = pnand %p718_p1, %p715_p0 }
   0x9   :  { %723 = shalt.err (!%p720_p2)
}
   0xa   :  { %s724_s20 = scalar_lea.vmem %s17_s10, 160  ;;  %p729_p4 = scmp.lt.s32.totalorder %s17_s10, %s17_s10 }
   0xb   :  { %p725_p3 = scmp.ne.s32.totalorder %s17_s10, %s724_s20  ;;  %p730_p5 = scmp.lt.s32.totalorder %s724_s20, %s724_s20 }
   0xd   :  { %p731_p6 = por %p730_p5, %p729_p4 }
   0xf   :  { %p732_p7 = pnand %p731_p6, %p725_p3 }
  0x11   :  { %735 = shalt.err (!%p732_p7)
}
  0x12   :  { %19 = dma.hbm_to_vmem [thread:$0]  %s857_s0, 160, %s17_s10, [#allocation3]  }
  0x13   :  { %s736_s25 = scalar_lea.hbm %s858_s1, 5120 }
  0x14   :  { %p737_p8 = scmp.ne.s32.totalorder %s858_s1, %s736_s25  ;;  %p740_p9 = scmp.lt.u32.totalorder %s736_s25, %s858_s1 }
  0x16   :  { %p742_p10 = pnand %p740_p9, %p737_p8 }
  0x18   :  { %745 = shalt.err (!%p742_p10)
}
  0x19   :  { %s746_s30 = scalar_lea.vmem %s809_s12, 5120  ;;  %p751_p12 = scmp.lt.s32.totalorder %s809_s12, %s809_s12 }
  0x1a   :  { %p747_p11 = scmp.ne.s32.totalorder %s809_s12, %s746_s30  ;;  %p752_p13 = scmp.lt.s32.totalorder %s746_s30, %s746_s30 }
  0x1c   :  { %p753_p0 = por %p752_p13, %p751_p12 }
  0x1e   :  { %p754_p1 = pnand %p753_p0, %p747_p11 }
  0x20   :  { %757 = shalt.err (!%p754_p1)
}
  0x21   :  { %s788_s0 = smov 64   ;;  %s789_s3 = smov 4  }
  0x22   :  { %31 = dma.hbm_to_vmem [thread:$0]  %s858_s1, 5120, %s809_s12, [#allocation6], %s788_s0, %s788_s0, %s789_s3  }
  0x23   :  { %780 = dma.done.wait [#allocation3], 160  }
  0x24   :  { %781 = vsyncadd [#allocation3], 4294967136 }
  0x25   :  { %782 = dma.done.wait [#allocation6], 5120  }
  0x26   :  { %783 = vsyncadd [#allocation6], 4294962176  ;;  %v671_v0 = vld [vmem:[#allocation5 + $0x40] sm:$0xff]   ;;  %v675_v4 = vld [vmem:[#allocation5 + $0x48] sm:$0xff]   ;;  %v790_v22 = vmov 1983009808   ;;  %v47_v24 = vlaneseq }
  0x27   :  { %v672_v1 = vld [vmem:[#allocation5 + $0xc0] sm:$0xff]   ;;  %590 = vmatprep.subr.bf16.mxu0 %v671_v0  ;;  %v676_v5 = vld [vmem:[#allocation5 + $0xc8] sm:$0xff]   ;;  %v679_v8 = vld [vmem:[#allocation5 + $0x50] sm:$0xff]   ;;  %v45_v23 = vunpack.c.l.s4 %v790_v22  ;;  %vm72_vm0 = vcmask 1041408   ;;  %v791_v41 = vmov 0.0   ;;  %vm792_vm1 = vmmov 0  }
  0x28   :  { %v673_v2 = vld [vmem:[#allocation5] sm:$0xff]   ;;  %612 = vmatprep.subr.bf16.mxu1 %v672_v1  ;;  %v677_v6 = vld [vmem:[#allocation5 + $0x8] sm:$0xff]   ;;  %v680_v9 = vld [vmem:[#allocation5 + $0xd0] sm:$0xff]   ;;  %v48_v30 = vshrl.u32 %v47_v24, 7  ;;  %s793_s1 = smov [#allocation7]  }
  0x29   :  { %v674_v3 = vld [vmem:[#allocation5 + $0x80] sm:$0xff]   ;;  %591 = vmatpush3.bf16.msra.mxu0 %v673_v2  ;;  %v678_v7 = vld [vmem:[#allocation5 + $0x88] sm:$0xff]   ;;  %v681_v10 = vld [vmem:[#allocation5 + $0x10] sm:$0xff]   ;;  %v46_v29 = vunpack.c.0.s8 %v45_v23  ;;  %s539_s6 = sshll.u32 %s793_s1, 4  ;;  %s540_s6 = int_to_ptr.vmem [resolvable:$true] %s539_s6 }
  0x2a   :  { %613 = vmatpush3.bf16.msra.mxu1 %v674_v3  ;;  %592 = vmatprep.subr.bf16.mxu0 %v675_v4  ;;  %v682_v11 = vld [vmem:[#allocation5 + $0x90] sm:$0xff]   ;;  %v683_v12 = vld [vmem:[#allocation5 + $0x58] sm:$0xff]   ;;  %v687_v16 = vld [vmem:[#allocation5 + $0x60] sm:$0xff]   ;;  %s758_s7 = scalar_lea.vmem %s540_s6, 32  ;;  %p763_p3 = scmp.lt.s32.totalorder %s540_s6, %s540_s6 }
  0x2b   :  { %614 = vmatprep.subr.bf16.mxu1 %v676_v5  ;;  %v684_v13 = vld [vmem:[#allocation5 + $0xd8] sm:$0xff]   ;;  %v688_v17 = vld [vmem:[#allocation5 + $0xe0] sm:$0xff]   ;;  %v691_v20 = vld [vmem:[#allocation5 + $0x68] sm:$0xff]   ;;  %v49_v35 = vsub.s32 %v46_v29, %v48_v30  ;;  %p759_p2 = scmp.ne.s32.totalorder %s540_s6, %s758_s7  ;;  %p764_p4 = scmp.lt.s32.totalorder %s758_s7, %s758_s7 }
  0x2c   :  { %v685_v14 = vld [vmem:[#allocation5 + $0x18] sm:$0xff]   ;;  %v689_v18 = vld [vmem:[#allocation5 + $0x20] sm:$0xff]   ;;  %v692_v21 = vld [vmem:[#allocation5 + $0xe8] sm:$0xff]  }
  0x2d   :  { %593 = vmatpush3.bf16.msra.mxu0 %v677_v6  ;;  %v686_v15 = vld [vmem:[#allocation5 + $0x98] sm:$0xff]   ;;  %v690_v19 = vld [vmem:[#allocation5 + $0xa0] sm:$0xff]   ;;  %v693_v25 = vld [vmem:[#allocation5 + $0x28] sm:$0xff]   ;;  %p765_p5 = por %p764_p4, %p763_p3 }
  0x2e   :  { %615 = vmatpush3.bf16.msra.mxu1 %v678_v7  ;;  %594 = vmatprep.subr.bf16.mxu0 %v679_v8  ;;  %v694_v26 = vld [vmem:[#allocation5 + $0xa8] sm:$0xff]   ;;  %v695_v27 = vld [vmem:[#allocation5 + $0x70] sm:$0xff]   ;;  %v699_v33 = vld [vmem:[#allocation5 + $0x78] sm:$0xff]  }
  0x2f   :  { %616 = vmatprep.subr.bf16.mxu1 %v680_v9  ;;  %v696_v28 = vld [vmem:[#allocation5 + $0xf0] sm:$0xff]   ;;  %v700_v34 = vld [vmem:[#allocation5 + $0xf8] sm:$0xff]   ;;  %v704_v49 = vld [vmem:[#allocation5 + $0x100] sm:$0xff]   ;;  %p766_p6 = pnand %p765_p5, %p759_p2 }
  0x30   :  { %v697_v31 = vld [vmem:[#allocation5 + $0x30] sm:$0xff]   ;;  %v701_v36 = vld [vmem:[#allocation5 + $0x38] sm:$0xff]   ;;  %v705_v57 = vld [vmem:[#allocation5 + $0x108] sm:$0xff]  }
  0x31   :  { %595 = vmatpush3.bf16.msra.mxu0 %v681_v10  ;;  %v698_v32 = vld [vmem:[#allocation5 + $0xb0] sm:$0xff]   ;;  %v702_v37 = vld [vmem:[#allocation5 + $0xb8] sm:$0xff]   ;;  %v708_v63 = vld [vmem:[#allocation5 + $0x120] sm:$0xff]  }
  0x32   :  { %617 = vmatpush3.bf16.msra.mxu1 %v682_v11  ;;  %596 = vmatprep.subr.bf16.mxu0 %v683_v12  ;;  %v39_v38 = vld [vmem:[#allocation2] sm:$0xff]  ;;  %v549_v55 = vld.sshfl [vmem:[#allocation2 + $0x8] sm:$0x3 pattern:$0x76325410]  ;;  %v709_v0 = vld [vmem:[#allocation5 + $0x128] sm:$0xff]  }
  0x33   :  { %618 = vmatprep.subr.bf16.mxu1 %v684_v13  ;;  %v50_v39 = vrot.slane %v39_v38, %v49_v35  ;;  %v43_v40 = vcombine.high %v39_v38, %v39_v38  ;;  %v80_v58 = vsel %vm72_vm0, %v549_v55, 0.0  ;;  %v706_v61 = vld [vmem:[#allocation5 + $0x110] sm:$0xff]   ;;  %v707_v62 = vld [vmem:[#allocation5 + $0x118] sm:$0xff]   ;;  %v90_v3 = vpack.c.bf16 %v549_v55, %v549_v55 }
  0x34   :  { %v710_v1 = vld [vmem:[#allocation5 + $0x130] sm:$0xff]   ;;  %v711_v2 = vld [vmem:[#allocation5 + $0x138] sm:$0xff]  }
  0x35   :  { %597 = vmatpush3.bf16.msra.mxu0 %v685_v14  ;;  %v58_v42 = vcombine.high %v50_v39, %v50_v39  ;;  %v73_v43 = vsel %vm72_vm0, %v50_v39, 0.0  ;;  %v57_v44 = vrot.slane %v43_v40, %v49_v35  ;;  %v86_v45 = vpack.c.bf16 %v50_v39, %v50_v39 }
  0x36   :  { %619 = vmatpush3.bf16.msra.mxu1 %v686_v15  ;;  %598 = vmatprep.subr.bf16.mxu0 %v687_v16 }
  0x37   :  { %620 = vmatprep.subr.bf16.mxu1 %v688_v17  ;;  %v74_v46 = vsel %vm72_vm0, %v58_v42, 0.0  ;;  %v87_v47 = vpack.c.bf16 %v58_v42, %v58_v42  ;;  %v59_v48 = vcombine.high %v57_v44, %v57_v44  ;;  %v88_v51 = vpack.c.bf16 %v57_v44, %v57_v44 }
  0x38   :  { %v75_v50 = vadd.f32 %v74_v46, %v73_v43  ;;  %v76_v52 = vsel %vm72_vm0, %v57_v44, 0.0 }
  0x39   :  { %599 = vmatpush3.bf16.msra.mxu0 %v689_v18  ;;  %443 = vmatprep.mubr.bf16.mxu0 %v87_v47  ;;  %v89_v53 = vpack.c.bf16 %v59_v48, %v59_v48  ;;  %v78_v54 = vsel %vm72_vm0, %v59_v48, 0.0 }
  0x3a   :  { %621 = vmatpush3.bf16.msra.mxu1 %v690_v19  ;;  %600 = vmatprep.subr.bf16.mxu0 %v691_v20  ;;  %v77_v56 = vadd.f32 %v76_v52, %v75_v50 }
  0x3b   :  { %622 = vmatprep.subr.bf16.mxu1 %v692_v21  ;;  %483 = vmatprep.mubr.bf16.mxu1 %v89_v53 }
  0x3c   :  { %v79_v59 = vadd.f32 %v78_v54, %v77_v56 }
  0x3d   :  { %601 = vmatpush3.bf16.msra.mxu0 %v693_v25 }
  0x3e   :  { %623 = vmatpush3.bf16.msra.mxu1 %v694_v26  ;;  %602 = vmatprep.subr.bf16.mxu0 %v695_v27  ;;  %v81_v60 = vadd.f32 %v80_v58, %v79_v59 }
  0x3f   :  { %624 = vmatprep.subr.bf16.mxu1 %v696_v28 }
  0x40   :  { %82 = vadd.xlane.f32.xlu0 %v81_v60 }
  0x41   :  { %603 = vmatpush3.bf16.msra.mxu0 %v697_v31 }
  0x42   :  { %625 = vmatpush3.bf16.msra.mxu1 %v698_v32  ;;  %604 = vmatprep.subr.bf16.mxu0 %v699_v33 }
  0x43   :  { %626 = vmatprep.subr.bf16.mxu1 %v700_v34 }
  0x45   :  { %605 = vmatpush3.bf16.msra.mxu0 %v701_v36 }
  0x46   :  { %627 = vmatpush3.bf16.msra.mxu1 %v702_v37  ;;  %643 = vmatprep.subr.bf16.mxu0 %v791_v41 }
  0x48   :  { %444 = vmatmul.mubr.bf16.vlgmr.msra.gmra.mrb[0].mxu0 %v86_v45 }
  0x49   :  { %644 = vmatpush3.bf16.msra.mxu0 %v704_v49  ;;  %484 = vmatmul.mubr.bf16.vlgmr.msra.gmra.mrb[0].mxu1 %v88_v51 }
  0x4a   :  { %645 = vmatprep.subr.bf16.mxu0 %v791_v41  ;;  %659 = vmatprep.mubr.msk.bf16.mxu0 %vm792_vm1, %v791_v41 }
  0x4d   :  { %646 = vmatpush3.bf16.msra.mxu0 %v705_v57 }
  0x4e   :  { %647 = vmatprep.subr.bf16.mxu0 %v791_v41 }
  0x51   :  { %648 = vmatpush3.bf16.msra.mxu0 %v706_v61 }
  0x52   :  { %649 = vmatprep.subr.bf16.mxu0 %v791_v41 }
  0x55   :  { %650 = vmatpush3.bf16.msra.mxu0 %v707_v62 }
  0x56   :  { %651 = vmatprep.subr.bf16.mxu0 %v791_v41 }
  0x59   :  { %652 = vmatpush3.bf16.msra.mxu0 %v708_v63 }
  0x5a   :  { %653 = vmatprep.subr.bf16.mxu0 %v791_v41 }
  0x5d   :  { %654 = vmatpush3.bf16.msra.mxu0 %v709_v0 }
  0x5e   :  { %655 = vmatprep.subr.bf16.mxu0 %v791_v41 }
  0x61   :  { %656 = vmatpush3.bf16.msra.mxu0 %v710_v1 }
  0x62   :  { %657 = vmatprep.subr.bf16.mxu0 %v791_v41 }
  0x65   :  { %658 = vmatpush3.bf16.msra.mxu0 %v711_v2 }
  0x68   :  { %660 = vmatmul.mubr.bf16.vlgmr.msra.gmra.mrb[4].mxu0 %v90_v3 }
  0xcd   :  { %v83_v15 = vpop.xlane.xlu0 %82 }
  0xce   :  { %v84_v16 = vmax.f32 %v83_v15, 1e-30 }
  0xd0   :  { %712 = vrcp.f32 %v84_v16 }
  0xda   :  { %v713_v17 = vpop.eup %712 }
 0x11b   :  { %v606_v4 = vpop.f32.mrb[0].mxu0 }
 0x11c   :  { %v607_v5 = vpop.f32.mrb[1].mxu0  ;;  %v628_v6 = vpop.f32.mrb[0].mxu1 }
 0x11d   :  { %v608_v7 = vadd.f32 %v607_v5, %v606_v4  ;;  %v609_v8 = vpop.f32.mrb[2].mxu0  ;;  %v629_v9 = vpop.f32.mrb[1].mxu1 }
 0x11e   :  { %v610_v10 = vpop.f32.mrb[3].mxu0  ;;  %v630_v11 = vadd.f32 %v629_v9, %v628_v6  ;;  %v631_v12 = vpop.f32.mrb[2].mxu1 }
 0x11f   :  { %v632_v13 = vpop.f32.mrb[3].mxu1 }
 0x120   :  { %v486_v14 = vadd.f32 %v630_v11, %v608_v7 }
 0x13b   :  { %v525_v18 = vpop.f32.mrb[4].mxu0 }
 0x13c   :  { %v526_v19 = vadd.f32 %v525_v18, %v486_v14  ;;  %v661_v20 = vpop.f32.mrb[5].mxu0 }
 0x13d   :  { %v528_v21 = vpop.f32.mrb[6].mxu0 }
 0x13e   :  { %v531_v22 = vmul.f32 %v713_v17, %v526_v19  ;;  %v662_v23 = vpop.f32.mrb[7].mxu0 }
 0x140   :  { %532 = vst [vmem:[#allocation7] sm:$0x3] %v531_v22 }
 0x141   :  { %769 = shalt.err (!%p766_p6)
}
 0x142   :  { %s770_s10 = scalar_lea.hbm %s859_s2, 32 }
 0x143   :  { %p771_p7 = scmp.ne.s32.totalorder %s859_s2, %s770_s10  ;;  %p774_p8 = scmp.lt.u32.totalorder %s770_s10, %s859_s2 }
 0x145   :  { %p776_p9 = pnand %p774_p8, %p771_p7 }
 0x147   :  { %779 = shalt.err (!%p776_p9)
}
 0x148   :  { %542 = dma.vmem_to_hbm [thread:$0]  %s540_s6, 32, %s859_s2, [#allocation4]  }
 0x149   :  { %784 = dma.done.wait [#allocation4], 32  }
 0x14a   :  { %785 = vsyncadd [#allocation4], 4294967264 }
 0x14b   :  { %546 = vsyncpa [#allocation3], 1 }
 0x14c   :  { %547 = vsyncpa [#allocation6], 1 }
 0x14d   :  { %548 = vsyncpa [#allocation4], 1 }

</bundles_post_ra>
